<compile_context>
chip_gen: v5e
topology: v5e:2x2
jax: 0.10.0
libtpu: 0.0.40
codegen_flags: <defaults>
</compile_context>

<pallas_src>
import functools

import jax
import jax.numpy as jnp
from jax.experimental import pallas as pl
from jax.experimental.pallas import tpu as pltpu

# TODO(synk): DEFAULT_EPSILON value is defined elsewhere in mlu; using 1e-10 here.
DEFAULT_EPSILON = 1e-10

_MIB = 1024 * 1024


def _js_div_kernel(p_ref, q_ref, o_ref, acc_ref, *, epsilon, rows, cols,
                   mask_rows, mask_cols):
    j = pl.program_id(1)          # column-block index (reduction axis, last in grid)
    nj = pl.num_programs(1)

    @pl.when(j == 0)
    def _():
        acc_ref[...] = jnp.zeros_like(acc_ref)

    p = p_ref[...].astype(jnp.float32)
    q = q_ref[...].astype(jnp.float32)
    eps = jnp.float32(epsilon)

    m = 0.5 * (p + q)
    lp = jnp.log(p + eps)
    lq = jnp.log(q + eps)
    lm = jnp.log(m + eps)
    # Fused elementwise JS contribution (algebraically identical to
    # -(m*lm) + 0.5*(p*lp + q*lq), fewer VALU ops).
    t = 0.5 * (p * (lp - lm) + q * (lq - lm))

    # Zero out padded rows/cols for non-divisible shapes (only emitted when needed).
    if mask_rows or mask_cols:
        tb, td = p_ref.shape
        i = pl.program_id(0)
        valid = None
        if mask_rows:
            rows_rem = rows - i * tb
            ri = jax.lax.broadcasted_iota(jnp.int32, (tb, td), 0)
            valid = ri < rows_rem
        if mask_cols:
            cols_rem = cols - j * td
            ci = jax.lax.broadcasted_iota(jnp.int32, (tb, td), 1)
            cmask = ci < cols_rem
            valid = cmask if valid is None else (valid & cmask)
        t = jnp.where(valid, t, 0.0)

    # Per-step: only a cross-sublane partial sum into a lane-shaped accumulator.
    acc_ref[...] += jnp.sum(t, axis=0, keepdims=True)

    @pl.when(j == nj - 1)
    def _():
        # Single cross-lane reduce per row block, then broadcast into the (8,128)
        # lane-aligned output block; the wrapper reads element [0, 0] of each block.
        partial = jnp.sum(acc_ref[...], keepdims=True)        # (1, 1)
        o_ref[...] = jnp.broadcast_to(partial, o_ref.shape)


def _round_up(x, m):
    return ((x + m - 1) // m) * m


def _chip_defaults():
    """(target_block_bytes, vmem_limit_bytes) chosen per TPU generation."""
    vmem_bytes = None
    try:
        info = pltpu.get_tpu_info()
        vmem_bytes = getattr(info, "vmem_capacity_bytes", None)
    except Exception:
        vmem_bytes = None
    if vmem_bytes is not None and vmem_bytes > 64 * _MIB:
        # v5e / v6e: 128 MiB VMEM, HBM-bound -> big blocks to amortize per-step overhead.
        return 8 * _MIB, 64 * _MIB
    # v7x (64 MiB VMEM, compute-bound) or unknown: conservative, still well-pipelined.
    return 2 * _MIB, 32 * _MIB


def _pick_blocks(B, D, target_block_bytes):
    """(tb, td): tb multiple of 8, td multiple of 128, block ~= target_block_bytes f32."""
    td_full = _round_up(D, 128)
    td_cap = max(128, ((target_block_bytes // (8 * 4)) // 128) * 128)
    td = min(td_full, td_cap)
    tb_full = _round_up(B, 8)
    tb_cap = max(8, ((target_block_bytes // (td * 4)) // 8) * 8)
    tb = min(tb_full, tb_cap)
    return tb, td


def js_div_loss(
    p,
    q,
    *,
    epsilon=DEFAULT_EPSILON,
    target_block_bytes=None,   # default: per-chip (see _chip_defaults)
    vmem_limit_bytes=None,     # default: per-chip (see _chip_defaults)
):
    """Jensen-Shannon divergence with 'mean' reduction over the batch dim.

    p, q: (B, D) probability distributions along the last dim (any float dtype;
    math is f32 in-kernel). Returns a scalar f32. Matches the PyTorch reference
    (eps inside the log, so JS(p, p) is not exactly 0).
    """
    assert p.shape == q.shape and p.ndim == 2
    B, D = p.shape

    auto_blk, auto_vmem = _chip_defaults()
    if target_block_bytes is None:
        target_block_bytes = auto_blk
    if vmem_limit_bytes is None:
        vmem_limit_bytes = auto_vmem

    tb, td = _pick_blocks(B, D, target_block_bytes)
    nb = pl.cdiv(B, tb)
    nd = pl.cdiv(D, td)

    kernel = functools.partial(
        _js_div_kernel,
        epsilon=epsilon,
        rows=B,
        cols=D,
        mask_rows=(B % tb) != 0,
        mask_cols=(D % td) != 0,
    )

    in_bytes = p.size * p.dtype.itemsize + q.size * q.dtype.itemsize
    cost = pl.CostEstimate(
        flops=12 * B * D,
        transcendentals=3 * B * D,
        bytes_accessed=in_bytes + nb * 8 * 128 * 4,
    )

    out = pl.pallas_call(
        kernel,
        out_shape=jax.ShapeDtypeStruct((nb, 8, 128), jnp.float32),
        grid_spec=pltpu.PrefetchScalarGridSpec(
            num_scalar_prefetch=0,
            grid=(nb, nd),
            in_specs=[
                pl.BlockSpec((tb, td), lambda i, j: (i, j)),
                pl.BlockSpec((tb, td), lambda i, j: (i, j)),
            ],
            out_specs=pl.BlockSpec((1, 8, 128), lambda i, j: (i, 0, 0)),
            scratch_shapes=[pltpu.VMEM((1, td), jnp.float32)],
        ),
        compiler_params=pltpu.CompilerParams(
            # Row blocks are independent partial sums (sharded across TCs on megacore
            # chips); the column axis is the per-row-block reduction, kept last.
            dimension_semantics=("parallel", "arbitrary"),
            vmem_limit_bytes=vmem_limit_bytes,
        ),
        cost_estimate=cost,
    )(p, q)

    # Combine per-row-block partials and apply the 'mean' reduction over batch rows.
    return jnp.sum(out[:, 0, 0]) / jnp.float32(B)


def _js_div_ref(p, q, epsilon=DEFAULT_EPSILON):
    def H(x):
        return jnp.mean(-jnp.sum(x * jnp.log(x + epsilon), axis=-1))

    m = 0.5 * (p + q)
    return H(m) - 0.5 * (H(p) + H(q))


if __name__ == "__main__":
    key = jax.random.PRNGKey(0)
    kp, kq = jax.random.split(key)

    # Small shapes consistent with the module: (batch, probability dim).
    B, D = 16, 128
    p = jax.nn.softmax(jax.random.normal(kp, (B, D), dtype=jnp.float32), axis=-1)
    q = jax.nn.softmax(jax.random.normal(kq, (B, D), dtype=jnp.float32), axis=-1)

    loss = js_div_loss(p, q)
    jax.block_until_ready(loss)
    ref = _js_div_ref(p, q)
    assert jnp.allclose(loss, ref, rtol=1e-5, atol=1e-6), (loss, ref)

    # Multi-row-block path with row masking (B not a multiple of the row tile) and
    # per-row-block partial outputs, via a tiny forced block budget.
    B2, D2 = 20, 384
    kp2, kq2 = jax.random.split(kq)
    p2 = jax.nn.softmax(jax.random.normal(kp2, (B2, D2), dtype=jnp.float32), axis=-1)
    q2 = jax.nn.softmax(jax.random.normal(kq2, (B2, D2), dtype=jnp.float32), axis=-1)
    loss2 = js_div_loss(p2, q2, target_block_bytes=16 * 1024)
    jax.block_until_ready(loss2)
    ref2 = _js_div_ref(p2, q2)
    assert jnp.allclose(loss2, ref2, rtol=1e-5, atol=1e-6), (loss2, ref2)

    # Column-reduction path with column masking (D not a multiple of 128) and
    # bf16 inputs (kernel upcasts to f32 internally).
    B3, D3 = 24, 200
    kp3, kq3 = jax.random.split(kq2)
    p3 = jax.nn.softmax(jax.random.normal(kp3, (B3, D3), dtype=jnp.float32), axis=-1)
    q3 = jax.nn.softmax(jax.random.normal(kq3, (B3, D3), dtype=jnp.float32), axis=-1)
    loss3 = js_div_loss(p3.astype(jnp.bfloat16), q3.astype(jnp.bfloat16),
                        target_block_bytes=4 * 1024)
    jax.block_until_ready(loss3)
    ref3 = _js_div_ref(p3.astype(jnp.bfloat16).astype(jnp.float32),
                       q3.astype(jnp.bfloat16).astype(jnp.float32))
    assert jnp.allclose(loss3, ref3, rtol=5e-3, atol=1e-4), (loss3, ref3)

    print("KERNEL_OK")
</pallas_src>

<mosaic_0001>
module attributes {stable_mosaic.version = 11 : i64} {
  func.func @_js_div_kernel(%arg0: i32, %arg1: i32, %arg2: memref<16x128xf32, #tpu.memory_space<vmem>>, %arg3: memref<16x128xf32, #tpu.memory_space<vmem>>, %arg4: memref<1x8x128xf32, #tpu.memory_space<vmem>>, %arg5: memref<1x128xf32, #tpu.memory_space<vmem>>) attributes {dimension_semantics = [#tpu.dimension_semantics<parallel>, #tpu.dimension_semantics<arbitrary>], iteration_bounds = array<i64: 1, 1>, scalar_prefetch = 0 : i64, scratch_operands = 1 : i64, tpu.core_type = #tpu.core_type<tc>, window_params = [{transform_indices = @transform_0, window_bounds = array<i64: 16, 128>}, {transform_indices = @transform_1, window_bounds = array<i64: 16, 128>}, {transform_indices = @transform_2, window_bounds = array<i64: 1, 8, 128>}]} {
    %c0_i32 = arith.constant 0 : i32
    %0 = arith.cmpi eq, %arg1, %c0_i32 : i32
    %1 = arith.extui %0 : i1 to i32
    %c0_i32_0 = arith.constant 0 : i32
    %2 = arith.cmpi ne, %1, %c0_i32_0 : i32
    scf.if %2 {
      %cst_15 = arith.constant 0.000000e+00 : f32
      %32 = vector.broadcast %cst_15 : f32 to vector<1x128xf32>
      %c0_16 = arith.constant 0 : index
      %c0_17 = arith.constant 0 : index
      %33 = vector.load %arg5[%c0_16, %c0_17] : memref<1x128xf32, #tpu.memory_space<vmem>>, vector<1x128xf32>
      tpu.vector_store %arg5[%c0_16, %c0_17], %32 {strides = array<i32>} : memref<1x128xf32, #tpu.memory_space<vmem>>, vector<1x128xf32>,
    } else {
    }
    %c0 = arith.constant 0 : index
    %c0_1 = arith.constant 0 : index
    %3 = vector.load %arg2[%c0, %c0_1] : memref<16x128xf32, #tpu.memory_space<vmem>>, vector<16x128xf32>
    %c0_2 = arith.constant 0 : index
    %c0_3 = arith.constant 0 : index
    %4 = vector.load %arg3[%c0_2, %c0_3] : memref<16x128xf32, #tpu.memory_space<vmem>>, vector<16x128xf32>
    %5 = arith.addf %3, %4 : vector<16x128xf32>
    %cst = arith.constant 5.000000e-01 : f32
    %6 = vector.broadcast %cst : f32 to vector<16x128xf32>
    %7 = arith.mulf %6, %5 : vector<16x128xf32>
    %cst_4 = arith.constant 1.000000e-10 : f32
    %8 = vector.broadcast %cst_4 : f32 to vector<16x128xf32>
    %9 = arith.addf %3, %8 : vector<16x128xf32>
    %10 = math.log %9 : vector<16x128xf32>
    %cst_5 = arith.constant 1.000000e-10 : f32
    %11 = vector.broadcast %cst_5 : f32 to vector<16x128xf32>
    %12 = arith.addf %4, %11 : vector<16x128xf32>
    %13 = math.log %12 : vector<16x128xf32>
    %cst_6 = arith.constant 1.000000e-10 : f32
    %14 = vector.broadcast %cst_6 : f32 to vector<16x128xf32>
    %15 = arith.addf %7, %14 : vector<16x128xf32>
    %16 = math.log %15 : vector<16x128xf32>
    %17 = arith.subf %10, %16 : vector<16x128xf32>
    %18 = arith.mulf %3, %17 : vector<16x128xf32>
    %19 = arith.subf %13, %16 : vector<16x128xf32>
    %20 = arith.mulf %4, %19 : vector<16x128xf32>
    %21 = arith.addf %18, %20 : vector<16x128xf32>
    %cst_7 = arith.constant 5.000000e-01 : f32
    %22 = vector.broadcast %cst_7 : f32 to vector<16x128xf32>
    %23 = arith.mulf %22, %21 : vector<16x128xf32>
    %c0_8 = arith.constant 0 : index
    %c0_9 = arith.constant 0 : index
    %24 = vector.load %arg5[%c0_8, %c0_9] : memref<1x128xf32, #tpu.memory_space<vmem>>, vector<1x128xf32>
    %cst_10 = arith.constant dense<0.000000e+00> : vector<128xf32>
    %25 = vector.multi_reduction <add>, %23, %cst_10 [0] : vector<16x128xf32> to vector<128xf32>
    %26 = vector.shape_cast %25 : vector<128xf32> to vector<1x128xf32>
    %27 = arith.addf %24, %26 : vector<1x128xf32>
    %c0_11 = arith.constant 0 : index
    %c0_12 = arith.constant 0 : index
    %28 = vector.load %arg5[%c0_11, %c0_12] : memref<1x128xf32, #tpu.memory_space<vmem>>, vector<1x128xf32>
    tpu.vector_store %arg5[%c0_11, %c0_12], %27 {strides = array<i32>} : memref<1x128xf32, #tpu.memory_space<vmem>>, vector<1x128xf32>,
    %c0_i32_13 = arith.constant 0 : i32
    %29 = arith.cmpi eq, %arg1, %c0_i32_13 : i32
    %30 = arith.extui %29 : i1 to i32
    %c0_i32_14 = arith.constant 0 : i32
    %31 = arith.cmpi ne, %30, %c0_i32_14 : i32
    scf.if %31 {
      %c0_15 = arith.constant 0 : index
      %c0_16 = arith.constant 0 : index
      %32 = vector.load %arg5[%c0_15, %c0_16] : memref<1x128xf32, #tpu.memory_space<vmem>>, vector<1x128xf32>
      %33 = vector.shape_cast %32 : vector<1x128xf32> to vector<1x1x128xf32>
      %cst_17 = arith.constant dense<0.000000e+00> : vector<1xf32>
      %34 = vector.multi_reduction <add>, %33, %cst_17 [1, 2] : vector<1x1x128xf32> to vector<1xf32>
      %35 = vector.shape_cast %34 : vector<1xf32> to vector<1x1x1xf32>
      %36 = vector.extract %35[0, 0, 0] : f32 from vector<1x1x1xf32>
      %37 = vector.broadcast %36 : f32 to vector<1x1xf32>
      %38 = vector.shape_cast %37 : vector<1x1xf32> to vector<1x1x1xf32>
      %39 = vector.broadcast %38 : vector<1x1x1xf32> to vector<1x8x128xf32>
      %c0_18 = arith.constant 0 : index
      %c0_19 = arith.constant 0 : index
      %c0_20 = arith.constant 0 : index
      %40 = vector.load %arg4[%c0_18, %c0_19, %c0_20] : memref<1x8x128xf32, #tpu.memory_space<vmem>>, vector<1x8x128xf32>
      tpu.vector_store %arg4[%c0_18, %c0_19, %c0_20], %39 {strides = array<i32>} : memref<1x8x128xf32, #tpu.memory_space<vmem>>, vector<1x8x128xf32>,
    } else {
    }
    return
  }
  func.func @transform_0(%arg0: i32, %arg1: i32) -> (i32, i32) {
    %c0_i32 = arith.constant 0 : i32
    return %arg0, %arg1 : i32, i32
  }
  func.func @transform_1(%arg0: i32, %arg1: i32) -> (i32, i32) {
    %c0_i32 = arith.constant 0 : i32
    return %arg0, %arg1 : i32, i32
  }
  func.func @transform_2(%arg0: i32, %arg1: i32) -> (i32, i32, i32) {
    %c0_i32 = arith.constant 0 : i32
    %c0_i32_0 = arith.constant 0 : i32
    %c0_i32_1 = arith.constant 0 : i32
    return %arg0, %c0_i32, %c0_i32_0 : i32, i32, i32
  }
}

</mosaic_0001>

<bundles_post_ra>
// kernel: tpu_custom_call.1
= control target key start
LH: loop header
LB: loop body
LE: loop exit
PB: predicated region body
PF: predicated region fallthrough
CT: control target
= control target key end

     0   :  { %7 = vsyncpa [#allocation4], 0  ;;  %s260_s0 = inlined_call_operand.hbm [shape: f32[16,128], index: 0, kind: input, shape index: {}]   ;;  %s261_s1 = inlined_call_operand.hbm [shape: f32[16,128], index: 1, kind: input, shape index: {}]   ;;  %s262_s2 = inlined_call_operand.hbm [shape: f32[1,8,128], index: 2, kind: output, shape index: {}]  }
   0x1   :  { %8 = vsyncpa [#allocation7], 0 }
   0x2   :  { %9 = vsyncpa [#allocation5], 0  ;;  %s14_s11 = sshll.u32 %s260_s0, 4  ;;  %s230_s12 = smov [#allocation3]   ;;  %s15_s11 = int_to_ptr.hbm [resolvable:$true] %s14_s11 }
   0x3   :  { %s16_s13 = sshll.u32 %s230_s12, 4  ;;  %s27_s16 = sshll.u32 %s261_s1, 4  ;;  %s17_s13 = int_to_ptr.vmem [resolvable:$true] %s16_s13  ;;  %s28_s16 = int_to_ptr.hbm [resolvable:$true] %s27_s16 }
   0x4   :  { %s231_s17 = smov 128   ;;  %s232_s18 = smov 8  }
   0x5   :  { %22 = dma.hbm_to_vmem [thread:$0]  %s15_s11, 256, %s17_s13, [#allocation4], %s231_s17, %s231_s17, %s232_s18  }
   0x6   :  { %s233_s19 = smov [#allocation6]  }
   0x7   :  { %s29_s20 = sshll.u32 %s233_s19, 4  ;;  %s30_s20 = int_to_ptr.vmem [resolvable:$true] %s29_s20 }
   0x8   :  { %35 = dma.hbm_to_vmem [thread:$0]  %s28_s16, 256, %s30_s20, [#allocation7], %s231_s17, %s231_s17, %s232_s18  }
   0x9   :  { %224 = dma.done.wait [#allocation4], 256  }
   0xa   :  { %225 = vsyncadd [#allocation4], 4294967040 }
   0xb   :  { %226 = dma.done.wait [#allocation7], 256  }
   0xc   :  { %227 = vsyncadd [#allocation7], 4294967040  ;;  %v234_v0 = vmov 0.0   ;;  %v49_v1 = vld [vmem:[#allocation3] sm:$0xff]  ;;  %v50_v2 = vld [vmem:[#allocation3 + $0x8] sm:$0xff]  ;;  %vm101_vm0 = vcmask 1040384  }
   0xd   :  { %48 = vst [vmem:[#allocation2] sm:$0x1] %v234_v0  ;;  %v51_v3 = vld [vmem:[#allocation6] sm:$0xff]  ;;  %v52_v4 = vld [vmem:[#allocation6 + $0x8] sm:$0xff]  ;;  %v57_v6 = vadd.f32 1e-10, %v49_v1 }
   0xe   :  { %v53_v5 = vadd.f32 %v51_v3, %v49_v1  ;;  %v58_v7 = vadd.f32 1e-10, %v50_v2  ;;  %v54_v8 = vadd.f32 %v52_v4, %v50_v2  ;;  %v63_v9 = vadd.f32 1e-10, %v51_v3  ;;  %s235_s0 = smov [#allocation8]   ;;  %s121_s23 = sshll.u32 %s262_s2, 4  ;;  %s122_s23 = int_to_ptr.hbm [resolvable:$true] %s121_s23 }
   0xf   :  { %v64_v10 = vadd.f32 1e-10, %v52_v4  ;;  %140 = vlog2.f32 %v57_v6  ;;  %s119_s1 = sshll.u32 %s235_s0, 4  ;;  %s120_s1 = int_to_ptr.vmem [resolvable:$true] %s119_s1 }
  0x10   :  { %v55_v11 = vmul.f32 0.5, %v53_v5  ;;  %v56_v12 = vmul.f32 0.5, %v54_v8  ;;  %142 = vlog2.f32 %v58_v7 }
  0x11   :  { %144 = vlog2.f32 %v63_v9 }
  0x12   :  { %v69_v13 = vadd.f32 1e-10, %v55_v11  ;;  %146 = vlog2.f32 %v64_v10  ;;  %v70_v14 = vadd.f32 1e-10, %v56_v12 }
  0x14   :  { %148 = vlog2.f32 %v69_v13  ;;  %v87_v45 = vld [vmem:[#allocation2] sm:$0x1] }
  0x15   :  { %150 = vlog2.f32 %v70_v14  ;;  %v141_v15 = vpop.eup %140 }
  0x16   :  { %v143_v16 = vpop.eup %142  ;;  %v60_v19 = vmul.f32 0.6931472, %v141_v15 }
  0x17   :  { %v145_v17 = vpop.eup %144  ;;  %v62_v22 = vmul.f32 0.6931472, %v143_v16 }
  0x18   :  { %v147_v18 = vpop.eup %146  ;;  %v66_v20 = vmul.f32 0.6931472, %v145_v17 }
  0x19   :  { %v68_v23 = vmul.f32 0.6931472, %v147_v18 }
  0x1a   :  { %v149_v21 = vpop.eup %148 }
  0x1b   :  { %v151_v24 = vpop.eup %150  ;;  %v72_v25 = vmul.f32 0.6931472, %v149_v21 }
  0x1c   :  { %v74_v26 = vmul.f32 0.6931472, %v151_v24 }
  0x1d   :  { %v75_v27 = vsub.f32 %v60_v19, %v72_v25  ;;  %v79_v28 = vsub.f32 %v66_v20, %v72_v25 }
  0x1e   :  { %v76_v29 = vsub.f32 %v62_v22, %v74_v26  ;;  %v80_v30 = vsub.f32 %v68_v23, %v74_v26 }
  0x1f   :  { %v77_v31 = vmul.f32 %v75_v27, %v49_v1  ;;  %v81_v32 = vmul.f32 %v79_v28, %v51_v3 }
  0x20   :  { %v78_v33 = vmul.f32 %v76_v29, %v50_v2  ;;  %v82_v34 = vmul.f32 %v80_v30, %v52_v4 }
  0x21   :  { %v83_v35 = vadd.f32 %v81_v32, %v77_v31 }
  0x22   :  { %v84_v36 = vadd.f32 %v82_v34, %v78_v33 }
  0x23   :  { %v85_v37 = vmul.f32 0.5, %v83_v35 }
  0x24   :  { %v86_v38 = vmul.f32 0.5, %v84_v36 }
  0x26   :  { %v88_v39 = vadd.f32 %v86_v38, %v85_v37 }
  0x28   :  { %v89_v40 = vrot.slane %v88_v39, 4 }
  0x2a   :  { %v90_v41 = vadd.f32 %v89_v40, %v88_v39 }
  0x2c   :  { %v91_v42 = vrot.slane %v90_v41, 2 }
  0x2e   :  { %v92_v43 = vadd.f32 %v91_v42, %v90_v41 }
  0x30   :  { %v93_v44 = vrot.slane %v92_v43, 1 }
  0x32   :  { %v94_v46 = vadd.f32 %v93_v44, %v92_v43 }
  0x34   :  { %v95_v47 = vadd.f32 %v94_v46, %v87_v45 }
  0x36   :  { %96 = vst [vmem:[#allocation2] sm:$0x1] %v95_v47 }
  0x3d   :  { %v100_v48 = vld [vmem:[#allocation2] sm:$0x1] }
  0x3e   :  { %v102_v49 = vsel %vm101_vm0, %v100_v48, 0.0 }
  0x3f   :  { %103 = vadd.xlane.f32.xlu0 %v102_v49 }
  0xb2   :  { %v104_v50 = vpop.xlane.xlu0 %103 }
  0xb3   :  { %v105_v51 = vrot.slane %v104_v50, 4 }
  0xb5   :  { %v106_v52 = vadd.f32 %v105_v51, %v104_v50 }
  0xb7   :  { %v107_v53 = vrot.slane %v106_v52, 2 }
  0xb9   :  { %v108_v54 = vadd.f32 %v107_v53, %v106_v52 }
  0xbb   :  { %v109_v55 = vrot.slane %v108_v54, 1 }
  0xbd   :  { %v110_v56 = vadd.f32 %v109_v55, %v108_v54 }
  0xbf   :  { %132 = vpush %v110_v56 }
  0xf0   :  { %s133_s24 = spop %132 }
  0xf1   :  { %v112_v57 = vstv %s133_s24 }
  0xf2   :  { %113 = vst [vmem:[#allocation8] sm:$0xff] %v112_v57 }
  0xf3   :  { %124 = dma.vmem_to_hbm [thread:$0]  %s120_s1, 128, %s122_s23, [#allocation5]  }
  0xf4   :  { %228 = dma.done.wait [#allocation5], 128  }
  0xf5   :  { %229 = vsyncadd [#allocation5], 4294967168 }
  0xf6   :  { %129 = vsyncpa [#allocation4], 1 }
  0xf7   :  { %130 = vsyncpa [#allocation7], 1 }
  0xf8   :  { %131 = vsyncpa [#allocation5], 1 }

</bundles_post_ra>
